<compile_context>
chip_gen: v7x
topology: tpu7x:2x2x1
jax: 0.10.0
libtpu: 0.0.40
codegen_flags: <defaults>
</compile_context>

<pallas_src>
import jax
import jax.numpy as jnp
from jax.experimental import pallas as pl
from jax.experimental.pallas import tpu as pltpu

NEG_SLOPE = 0.01  # nn.LeakyReLU default negative_slope


def _leaky_relu(h):
    return jnp.where(h > 0, h, NEG_SLOPE * h)


def dense_network_kernel(x_ref, w1_ref, w2_ref, w3_ref, w4_ref, o_ref):
    """Whole 4-layer MLP on one (tile_b, D) batch tile, fully in VMEM.

    x_ref / w*_ref are bf16 (MXU-native). Every dot accumulates in f32; the
    activation is re-quantized to bf16 before feeding the next MXU pass.
    """
    cd = x_ref.dtype
    h = jnp.dot(x_ref[...], w1_ref[...], preferred_element_type=jnp.float32)
    h = _leaky_relu(h)
    h = jnp.dot(h.astype(cd), w2_ref[...], preferred_element_type=jnp.float32)
    h = _leaky_relu(h)
    h = jnp.dot(h.astype(cd), w3_ref[...], preferred_element_type=jnp.float32)
    h = _leaky_relu(h)
    h = jnp.dot(h.astype(cd), w4_ref[...], preferred_element_type=jnp.float32)
    o_ref[...] = h.astype(o_ref.dtype)


def prepare_weights(w1, w2, w3, w4, *, compute_dtype=jnp.bfloat16):
    """One-time (parameter-load-time) prep: transpose PyTorch (out, in) weights
    to (in, out) and cast to the MXU compute dtype, so the per-call path does
    x @ Wt with no transpose / cast HLOs and half the weight HBM traffic."""
    return tuple(jnp.asarray(w.T, dtype=compute_dtype) for w in (w1, w2, w3, w4))


def _choose_tile_b(B, *, sublane, max_tile=512):
    """Largest sublane-multiple tile <= max_tile that divides B, preferring a
    >=2-step grid so the batch axis can shard across v7x's two TensorCores."""
    if B <= sublane:
        return B  # block == full array dim: always a legal layout
    candidates = [t for t in range(sublane, min(B, max_tile) + 1, sublane)
                  if B % t == 0]
    if not candidates:
        return min(B, max_tile) if B % sublane == 0 else B
    tile = candidates[-1]
    if tile == B and len(candidates) > 1:
        tile = candidates[-2]  # force >=2 grid steps when possible
    return tile


def dense_network_forward(x, prepared_weights, *, tile_b=None,
                          out_dtype=jnp.float32):
    """x: (B, D). prepared_weights: output of prepare_weights (4x (D, D) bf16)."""
    B, D = x.shape
    w1t, w2t, w3t, w4t = prepared_weights
    compute_dtype = w1t.dtype
    sublane = 16 if compute_dtype == jnp.bfloat16 else 8
    if tile_b is None:
        tile_b = _choose_tile_b(B, sublane=sublane)
    elif tile_b != B and tile_b % sublane != 0:
        raise ValueError(
            f"tile_b={tile_b} must equal B or be a multiple of {sublane} for "
            f"{jnp.dtype(compute_dtype).name} tiles")

    x_c = x.astype(compute_dtype)  # halves x DMA bytes; feeds the bf16 MXU path
    grid = (pl.cdiv(B, tile_b),)

    itemsize = jnp.dtype(compute_dtype).itemsize
    cost = pl.CostEstimate(
        flops=2 * 4 * B * D * D,
        transcendentals=0,
        bytes_accessed=(B * D * itemsize                          # x
                        + 4 * D * D * itemsize                    # 4 weights
                        + B * D * jnp.dtype(out_dtype).itemsize),  # out
    )

    w_spec = pl.BlockSpec((D, D), lambda i: (0, 0))  # grid-invariant -> resident
    return pl.pallas_call(
        dense_network_kernel,
        out_shape=jax.ShapeDtypeStruct((B, D), out_dtype),
        grid_spec=pltpu.PrefetchScalarGridSpec(
            num_scalar_prefetch=0,
            grid=grid,
            in_specs=[
                pl.BlockSpec((tile_b, D), lambda i: (i, 0)),
                w_spec, w_spec, w_spec, w_spec,
            ],
            out_specs=pl.BlockSpec((tile_b, D), lambda i: (i, 0)),
        ),
        compiler_params=pltpu.CompilerParams(
            dimension_semantics=("parallel",)),
        cost_estimate=cost,
    )(x_c, w1t, w2t, w3t, w4t)


if __name__ == "__main__":
    # Small shapes consistent with the module: layer_size=128 (one lane tile),
    # batch=256 so the auto-chosen tile_b=128 yields a 2-step parallel grid.
    batch, layer_size = 256, 128
    key = jax.random.PRNGKey(0)
    kx, k1, k2, k3, k4 = jax.random.split(key, 5)

    x = jax.random.normal(kx, (batch, layer_size), dtype=jnp.float32)
    bound = 1.0 / (layer_size ** 0.5)  # PyTorch Linear default init scale
    init = lambda k: jax.random.uniform(
        k, (layer_size, layer_size), minval=-bound, maxval=bound,
        dtype=jnp.float32)
    w1, w2, w3, w4 = init(k1), init(k2), init(k3), init(k4)

    prepared = prepare_weights(w1, w2, w3, w4)  # once, at "parameter load" time
    out = dense_network_forward(x, prepared)
    out = jax.block_until_ready(out)
    assert out.shape == (batch, layer_size)
    assert out.dtype == jnp.float32

    # Reference 1: same bf16-operand / f32-accumulate math as the kernel.
    def ref_matched(x, wts):
        h = x.astype(jnp.bfloat16)
        for i, wt in enumerate(wts):
            h = jax.lax.dot_general(h, wt, (((1,), (0,)), ((), ())),
                                    preferred_element_type=jnp.float32)
            if i < 3:
                h = _leaky_relu(h).astype(jnp.bfloat16)
        return h

    # Reference 2: the original f32 PyTorch semantics (x @ W.T, LeakyReLU).
    def ref_f32(x):
        h = _leaky_relu(x @ w1.T)
        h = _leaky_relu(h @ w2.T)
        h = _leaky_relu(h @ w3.T)
        return h @ w4.T

    expected = ref_matched(x, prepared)
    assert jnp.allclose(out, expected, atol=2e-3, rtol=2e-3), \
        "Pallas output mismatch vs matched bf16 reference"
    assert jnp.allclose(out, ref_f32(x), atol=5e-2, rtol=5e-2), \
        "Pallas output drifted too far from f32 reference"

    print("KERNEL_OK")
</pallas_src>

<mosaic_0001>
module attributes {stable_mosaic.version = 11 : i64} {
  func.func @dense_network_kernel(%arg0: i32, %arg1: memref<128x128xbf16, #tpu.memory_space<vmem>>, %arg2: memref<128x128xbf16, #tpu.memory_space<vmem>>, %arg3: memref<128x128xbf16, #tpu.memory_space<vmem>>, %arg4: memref<128x128xbf16, #tpu.memory_space<vmem>>, %arg5: memref<128x128xbf16, #tpu.memory_space<vmem>>, %arg6: memref<128x128xf32, #tpu.memory_space<vmem>>) attributes {dimension_semantics = [#tpu.dimension_semantics<parallel>], iteration_bounds = array<i64: 2>, scalar_prefetch = 0 : i64, scratch_operands = 0 : i64, tpu.core_type = #tpu.core_type<tc>, window_params = [{transform_indices = @transform_0, window_bounds = array<i64: 128, 128>}, {pipeline_mode = #tpu.pipeline_mode<synchronous>, transform_indices = @transform_1, window_bounds = array<i64: 128, 128>}, {pipeline_mode = #tpu.pipeline_mode<synchronous>, transform_indices = @transform_2, window_bounds = array<i64: 128, 128>}, {pipeline_mode = #tpu.pipeline_mode<synchronous>, transform_indices = @transform_3, window_bounds = array<i64: 128, 128>}, {pipeline_mode = #tpu.pipeline_mode<synchronous>, transform_indices = @transform_4, window_bounds = array<i64: 128, 128>}, {transform_indices = @transform_5, window_bounds = array<i64: 128, 128>}]} {
    %c0 = arith.constant 0 : index
    %c0_0 = arith.constant 0 : index
    %0 = vector.load %arg1[%c0, %c0_0] : memref<128x128xbf16, #tpu.memory_space<vmem>>, vector<128x128xbf16>
    %c0_1 = arith.constant 0 : index
    %c0_2 = arith.constant 0 : index
    %1 = vector.load %arg2[%c0_1, %c0_2] : memref<128x128xbf16, #tpu.memory_space<vmem>>, vector<128x128xbf16>
    %cst = arith.constant dense<0.000000e+00> : vector<128x128xf32>
    %2 = tpu.matmul %0, %1, %cst {dimension_numbers = #tpu.dot_dimension_numbers<[1], [0], [0], [1], [0, 0, 1, 1], [], []>} : vector<128x128xbf16>, vector<128x128xbf16>, vector<128x128xf32> -> vector<128x128xf32>
    %cst_3 = arith.constant 0.000000e+00 : f32
    %3 = vector.broadcast %cst_3 : f32 to vector<128x128xf32>
    %4 = arith.cmpf ogt, %2, %3 : vector<128x128xf32>
    %cst_4 = arith.constant 0.00999999977 : f32
    %5 = vector.broadcast %cst_4 : f32 to vector<128x128xf32>
    %6 = arith.mulf %5, %2 : vector<128x128xf32>
    %7 = arith.select %4, %2, %6 : vector<128x128xi1>, vector<128x128xf32>
    %8 = arith.truncf %7 : vector<128x128xf32> to vector<128x128xbf16>
    %c0_5 = arith.constant 0 : index
    %c0_6 = arith.constant 0 : index
    %9 = vector.load %arg3[%c0_5, %c0_6] : memref<128x128xbf16, #tpu.memory_space<vmem>>, vector<128x128xbf16>
    %cst_7 = arith.constant dense<0.000000e+00> : vector<128x128xf32>
    %10 = tpu.matmul %8, %9, %cst_7 {dimension_numbers = #tpu.dot_dimension_numbers<[1], [0], [0], [1], [0, 0, 1, 1], [], []>} : vector<128x128xbf16>, vector<128x128xbf16>, vector<128x128xf32> -> vector<128x128xf32>
    %cst_8 = arith.constant 0.000000e+00 : f32
    %11 = vector.broadcast %cst_8 : f32 to vector<128x128xf32>
    %12 = arith.cmpf ogt, %10, %11 : vector<128x128xf32>
    %cst_9 = arith.constant 0.00999999977 : f32
    %13 = vector.broadcast %cst_9 : f32 to vector<128x128xf32>
    %14 = arith.mulf %13, %10 : vector<128x128xf32>
    %15 = arith.select %12, %10, %14 : vector<128x128xi1>, vector<128x128xf32>
    %16 = arith.truncf %15 : vector<128x128xf32> to vector<128x128xbf16>
    %c0_10 = arith.constant 0 : index
    %c0_11 = arith.constant 0 : index
    %17 = vector.load %arg4[%c0_10, %c0_11] : memref<128x128xbf16, #tpu.memory_space<vmem>>, vector<128x128xbf16>
    %cst_12 = arith.constant dense<0.000000e+00> : vector<128x128xf32>
    %18 = tpu.matmul %16, %17, %cst_12 {dimension_numbers = #tpu.dot_dimension_numbers<[1], [0], [0], [1], [0, 0, 1, 1], [], []>} : vector<128x128xbf16>, vector<128x128xbf16>, vector<128x128xf32> -> vector<128x128xf32>
    %cst_13 = arith.constant 0.000000e+00 : f32
    %19 = vector.broadcast %cst_13 : f32 to vector<128x128xf32>
    %20 = arith.cmpf ogt, %18, %19 : vector<128x128xf32>
    %cst_14 = arith.constant 0.00999999977 : f32
    %21 = vector.broadcast %cst_14 : f32 to vector<128x128xf32>
    %22 = arith.mulf %21, %18 : vector<128x128xf32>
    %23 = arith.select %20, %18, %22 : vector<128x128xi1>, vector<128x128xf32>
    %24 = arith.truncf %23 : vector<128x128xf32> to vector<128x128xbf16>
    %c0_15 = arith.constant 0 : index
    %c0_16 = arith.constant 0 : index
    %25 = vector.load %arg5[%c0_15, %c0_16] : memref<128x128xbf16, #tpu.memory_space<vmem>>, vector<128x128xbf16>
    %cst_17 = arith.constant dense<0.000000e+00> : vector<128x128xf32>
    %26 = tpu.matmul %24, %25, %cst_17 {dimension_numbers = #tpu.dot_dimension_numbers<[1], [0], [0], [1], [0, 0, 1, 1], [], []>} : vector<128x128xbf16>, vector<128x128xbf16>, vector<128x128xf32> -> vector<128x128xf32>
    %c0_18 = arith.constant 0 : index
    %c0_19 = arith.constant 0 : index
    %27 = vector.load %arg6[%c0_18, %c0_19] : memref<128x128xf32, #tpu.memory_space<vmem>>, vector<128x128xf32>
    tpu.vector_store %arg6[%c0_18, %c0_19], %26 {strides = array<i32>} : memref<128x128xf32, #tpu.memory_space<vmem>>, vector<128x128xf32>,
    return
  }
  func.func @transform_0(%arg0: i32) -> (i32, i32) {
    %c0_i32 = arith.constant 0 : i32
    %c0_i32_0 = arith.constant 0 : i32
    return %arg0, %c0_i32 : i32, i32
  }
  func.func @transform_1(%arg0: i32) -> (i32, i32) {
    %c0_i32 = arith.constant 0 : i32
    %c0_i32_0 = arith.constant 0 : i32
    %c0_i32_1 = arith.constant 0 : i32
    return %c0_i32, %c0_i32_0 : i32, i32
  }
  func.func @transform_2(%arg0: i32) -> (i32, i32) {
    %c0_i32 = arith.constant 0 : i32
    %c0_i32_0 = arith.constant 0 : i32
    %c0_i32_1 = arith.constant 0 : i32
    return %c0_i32, %c0_i32_0 : i32, i32
  }
  func.func @transform_3(%arg0: i32) -> (i32, i32) {
    %c0_i32 = arith.constant 0 : i32
    %c0_i32_0 = arith.constant 0 : i32
    %c0_i32_1 = arith.constant 0 : i32
    return %c0_i32, %c0_i32_0 : i32, i32
  }
  func.func @transform_4(%arg0: i32) -> (i32, i32) {
    %c0_i32 = arith.constant 0 : i32
    %c0_i32_0 = arith.constant 0 : i32
    %c0_i32_1 = arith.constant 0 : i32
    return %c0_i32, %c0_i32_0 : i32, i32
  }
  func.func @transform_5(%arg0: i32) -> (i32, i32) {
    %c0_i32 = arith.constant 0 : i32
    %c0_i32_0 = arith.constant 0 : i32
    return %arg0, %c0_i32 : i32, i32
  }
}

</mosaic_0001>

<bundles_post_ra>
// kernel: tpu_custom_call.1
= control target key start
LH: loop header
LB: loop body
LE: loop exit
PB: predicated region body
PF: predicated region fallthrough
CT: control target
= control target key end

     0   :  { %10 = vsyncpa [#allocation3], 0  ;;  %s2288_s0 = inlined_call_operand.hbm [shape: bf16[256,128], index: 0, kind: input, shape index: {}]   ;;  %s2289_s1 = inlined_call_operand.hbm [shape: bf16[128,128], index: 1, kind: input, shape index: {}]   ;;  %s2290_s2 = inlined_call_operand.hbm [shape: bf16[128,128], index: 2, kind: input, shape index: {}]   ;;  %s2291_s3 = inlined_call_operand.hbm [shape: bf16[128,128], index: 3, kind: input, shape index: {}]   ;;  %s2292_s4 = inlined_call_operand.hbm [shape: bf16[128,128], index: 4, kind: input, shape index: {}]   ;;  %s2293_s5 = inlined_call_operand.hbm [shape: f32[256,128], index: 5, kind: output, shape index: {}]  }
   0x1   :  { %12 = vsyncpa [#allocation3 + $0x1], 0 }
   0x2   :  { %13 = vsyncpa [#allocation6], 0 }
   0x3   :  { %14 = vsyncpa [#allocation9], 0 }
   0x4   :  { %15 = vsyncpa [#allocation4], 0 }
   0x5   :  { %17 = vsyncpa [#allocation4 + $0x1], 0  ;;  %s1966_s18 = smov 0   ;;  %s1968_s19 = smov 0  }
   0x6   :  { %s1970_s20 = smov 0   ;;  %s1972_s21 = smov 0  }
   0x7 LB: > { %s1987_s22 = sadd.s32 4294967295, %s1924_s21   ;;  %s1321_s23 = sadd.s32 4294967294, %s1924_s21   ;;  %s1924_s21 = sphi %s1972_s21, %s2316_s21   ;;  %s1920_s20 = sphi %s1970_s20, %s2315_s20   ;;  %s1916_s19 = sphi %s1968_s19, %s2314_s19   ;;  %s1912_s18 = sphi %s1966_s18, %s2313_s18  }
   0x8   : > { %p43_p0 = scmp.ne.s32.totalorder %s1916_s19, %s1912_s18  ;;  %p2294_p1 = scmp.eq.s32.totalorder %s1987_s22, 0 }
   0x9   : > { %p157_p3 = scmp.eq.s32.totalorder %s1321_s23, 1  ;;  %p1322_p5 = scmp.ge.s32.totalorder %s1924_s21, 1 }
   0xa   : > { %p1996_p4 = por %p2294_p1, %p43_p0  ;;  %p164_p7 = scmp.lt.s32.totalorder %s1924_s21, 3 }
   0xb   : > { %p2001_p6 = por %p157_p3, %p43_p0  ;;  %s1926_s27 = smov [#allocation5]  }
   0xc   : > { %s2297_s24 = scalar_select %p1996_p4, 1, 0 }
   0xd   : > { %s2298_s25 = scalar_select %p2001_p6, 1, 0 }
   0xe   : > { %p2006_p8 = pnand %p1322_p5, %p164_p7  ;;  %s176_s28 = sshll.u32 %s1926_s27, 4  ;;  %s2010_s28 = int_to_ptr.vmem [resolvable:$true] %s176_s28 }
   0xf   : > { %s1927_s30 = smov [#allocation8]   ;;  %s1928_s7 = smov [#allocation7]  }
  0x10   : > { %s2299_s26 = scalar_select %p2006_p8, 1, 0 }
  0x11   : > { %p1597_p9 = pneg %p2006_p8  ;;  %s202_s6 = sshll.u32 %s1927_s30, 4  ;;  %s2021_s6 = int_to_ptr.vmem [resolvable:$true] %s202_s6 }
  0x12   : > { %s2023_s8 = sshll.u32 %s1928_s7, 4  ;;  %s1708_s11 = scalar_lea.hbm %s2289_s1, 1024  ;;  %s190_s8 = int_to_ptr.vmem [resolvable:$true] %s2023_s8 }
  0x13   : > { %p2017_p11 = pnand %p1597_p9, %p2294_p1  ;;  %p1709_p12 = scmp.ne.s32.totalorder %s2289_s1, %s1708_s11 }
  0x14   : > { %p1715_p5 = scmp.lt.u32.totalorder %s1708_s11, %s2289_s1 }
  0x15   : > { %p2033_p13 = pneg %p2017_p11 }
  0x17   : > { %p1711_p0 = pnand %p2033_p13, %p1709_p12 }
  0x19   : > { %p1712_p3 = pneg %p1711_p0 }
  0x1b   : > { %p1717_p7 = pnand %p1715_p5, %p1712_p3 }
  0x1d   : > { %1720 = shalt.err (!%p1717_p7)
}
  0x1e   : > { %s1721_s17 = scalar_lea.vmem %s2010_s28, 1024  ;;  %p1729_p2 = scmp.lt.s32.totalorder %s2010_s28, %s2010_s28 }
  0x1f   : > { %p1722_p9 = scmp.ne.s32.totalorder %s2010_s28, %s1721_s17  ;;  %p1730_p6 = scmp.lt.s32.totalorder %s1721_s17, %s1721_s17 }
  0x21   : > { %p1724_p10 = pnand %p1722_p9, %p2033_p13  ;;  %p1731_p12 = por %p1730_p6, %p1729_p2 }
  0x23   : > { %p1725_p1 = pneg %p1724_p10 }
  0x25   : > { %p1732_p0 = pnand %p1731_p12, %p1725_p1 }
  0x27   : > { %1735 = shalt.err (!%p1732_p0)
}
  0x28   : > { %s1929_s23 = smov 64   ;;  %s1930_s27 = smov 4  }
  0x29   : > { %1600 = dma.hbm_to_vmem [thread:$0]  (!%p2017_p11), %s2289_s1, 1024, %s2010_s28, [#allocation6], %s1929_s23, %s1929_s23, %s1930_s27  }
  0x2a   : > { %s1736_s11 = scalar_lea.hbm %s2291_s3, 1024 }
  0x2b   : > { %p1737_p1 = scmp.ne.s32.totalorder %s2291_s3, %s1736_s11  ;;  %p1743_p10 = scmp.lt.u32.totalorder %s1736_s11, %s2291_s3 }
  0x2d   : > { %p1739_p2 = pnand %p1737_p1, %p2033_p13 }
  0x2f   : > { %p1740_p6 = pneg %p1739_p2 }
  0x31   : > { %p1745_p3 = pnand %p1743_p10, %p1740_p6 }
  0x33   : > { %1748 = shalt.err (!%p1745_p3)
}
  0x34   : > { %s1749_s28 = scalar_lea.vmem %s2021_s6, 1024  ;;  %p1757_p12 = scmp.lt.s32.totalorder %s2021_s6, %s2021_s6 }
  0x35   : > { %p1750_p5 = scmp.ne.s32.totalorder %s2021_s6, %s1749_s28  ;;  %p1758_p0 = scmp.lt.s32.totalorder %s1749_s28, %s1749_s28 }
  0x37   : > { %p1752_p7 = pnand %p1750_p5, %p2033_p13  ;;  %p1759_p1 = por %p1758_p0, %p1757_p12 }
  0x39   : > { %p1753_p9 = pneg %p1752_p7 }
  0x3b   : > { %p1760_p2 = pnand %p1759_p1, %p1753_p9 }
  0x3d   : > { %1763 = shalt.err (!%p1760_p2)
}
  0x3e   : > { %1606 = dma.hbm_to_vmem [thread:$0]  (!%p2017_p11), %s2291_s3, 1024, %s2021_s6, [#allocation9], %s1929_s23, %s1929_s23, %s1930_s27  }
  0x3f   : > { %s1764_s10 = scalar_lea.hbm %s2290_s2, 1024 }
  0x40   : > { %p1765_p6 = scmp.ne.s32.totalorder %s2290_s2, %s1764_s10  ;;  %p1771_p5 = scmp.lt.u32.totalorder %s1764_s10, %s2290_s2 }
  0x42   : > { %p1767_p10 = pnand %p1765_p6, %p2033_p13 }
  0x44   : > { %p1768_p3 = pneg %p1767_p10 }
  0x46   : > { %p1773_p7 = pnand %p1771_p5, %p1768_p3 }
  0x48   : > { %1776 = shalt.err (!%p1773_p7)
}
  0x49   : > { %s1777_s16 = scalar_lea.vmem %s190_s8, 1024  ;;  %p1785_p1 = scmp.lt.s32.totalorder %s190_s8, %s190_s8 }
  0x4a   : > { %p1778_p9 = scmp.ne.s32.totalorder %s190_s8, %s1777_s16  ;;  %p1786_p2 = scmp.lt.s32.totalorder %s1777_s16, %s1777_s16 }
  0x4c   : > { %p1780_p12 = pnand %p1778_p9, %p2033_p13  ;;  %p1787_p4 = por %p1786_p2, %p1785_p1 }
  0x4e   : > { %p1781_p0 = pneg %p1780_p12 }
  0x50   : > { %p1788_p8 = pnand %p1787_p4, %p1781_p0 }
  0x52   : > { %1791 = shalt.err (!%p1788_p8)
}
  0x53   : > { %1603 = dma.hbm_to_vmem [thread:$0]  (!%p2017_p11), %s2290_s2, 1024, %s190_s8, [#allocation6], %s1929_s23, %s1929_s23, %s1930_s27  }
  0x54   : > { %s1931_s17 = smov [#allocation10]   ;;  %s1792_s10 = scalar_lea.hbm %s2292_s4, 1024 }
  0x55   : > { %s215_s30 = sshll.u32 %s1931_s17, 4  ;;  %p1793_p4 = scmp.ne.s32.totalorder %s2292_s4, %s1792_s10  ;;  %s216_s30 = int_to_ptr.vmem [resolvable:$true] %s215_s30 }
  0x56   : > { %p1799_p10 = scmp.lt.u32.totalorder %s1792_s10, %s2292_s4 }
  0x57   : > { %p1795_p8 = pnand %p1793_p4, %p2033_p13 }
  0x59   : > { %p1796_p6 = pneg %p1795_p8 }
  0x5b   : > { %p1801_p3 = pnand %p1799_p10, %p1796_p6 }
  0x5d   : > { %1804 = shalt.err (!%p1801_p3)
}
  0x5e   : > { %s1805_s8 = scalar_lea.vmem %s216_s30, 1024  ;;  %p1813_p12 = scmp.lt.s32.totalorder %s216_s30, %s216_s30 }
  0x5f   : > { %p1806_p5 = scmp.ne.s32.totalorder %s216_s30, %s1805_s8  ;;  %p1814_p0 = scmp.lt.s32.totalorder %s1805_s8, %s1805_s8 }
  0x61   : > { %p1808_p7 = pnand %p1806_p5, %p2033_p13  ;;  %p1815_p1 = por %p1814_p0, %p1813_p12 }
  0x63   : > { %p1809_p9 = pneg %p1808_p7 }
  0x65   : > { %p1816_p2 = pnand %p1815_p1, %p1809_p9 }
  0x67   : > { %1819 = shalt.err (!%p1816_p2)
}
  0x68   : > { %1609 = dma.hbm_to_vmem [thread:$0]  (!%p2017_p11), %s2292_s4, 1024, %s216_s30, [#allocation9], %s1929_s23, %s1929_s23, %s1930_s27  }
  0x69   : > { %s2127_s14 = sadd.s32 1, %s1924_s21   ;;  %s30_s29 = sadd.s32 1, %s1920_s20 }
  0x6a   : > { %s27_s28 = ssub.s32 %s1924_s21, %s2127_s14  ;;  %p37_p13 = scmp.ne.s32.totalorder %s1920_s20, %s1916_s19 }
  0x6b   : > { %p28_p4 = scmp.eq.s32.totalorder %s27_s28, 0  ;;  %p38_p8 = scmp.eq.s32.totalorder %s1924_s21, 0 }
  0x6c   : > { %p2302_p6 = scmp.eq.s32.totalorder %s1987_s22, 1  ;;  %p1622_p3 = scmp.lt.s32.totalorder %s1924_s21, 2 }
  0x6d   : > { %s2143_s7 = scalar_select %p28_p4, %s1920_s20, %s30_s29  }
  0x6e   : > { %p2137_p10 = por %p2302_p6, %p37_p13  ;;  %p39_p5 = por %p38_p8, %p37_p13 }
  0x6f   : > { %s229_s9 = sand.u32 1, %s1920_s20   ;;  %s1383_s30 = sshll.u32 %s1924_s21, 10 }
  0x70   : > { %s1328_s10 = sshll.u32 %s229_s9, 6  ;;  %s2150_s13 = scalar_lea.hbm %s2288_s0, %s1383_s30 }
  0x71   : > { %s233_s15 = scalar_lea.vmem [#allocation2], %s1328_s10  ;;  %p2154_p11 = pnand %p1622_p3, %p39_p5 }
  0x72   : > { %s240_s8 = sshll.u32 %s233_s15, 4  ;;  %s2158_s6 = scalar_lea.sflag [#allocation3], %s229_s9  ;;  %s2152_s8 = int_to_ptr.vmem [resolvable:$true] %s240_s8 }
  0x73   : > { %s1820_s29 = scalar_lea.hbm %s2150_s13, 1024  ;;  %p1822_p9 = pneg %p2154_p11 }
  0x74   : > { %p1821_p7 = scmp.ne.s32.totalorder %s2150_s13, %s1820_s29  ;;  %s1825_s30 = scalar_lea.hbm %s2288_s0, 2048 }
  0x75   : > { %p1826_p1 = scmp.lt.u32.totalorder %s2150_s13, %s2288_s0  ;;  %p1827_p2 = scmp.lt.u32.totalorder %s1825_s30, %s1820_s29 }
  0x76   : > { %p1823_p12 = pnand %p1822_p9, %p1821_p7  ;;  %p1829_p4 = scmp.lt.u32.totalorder %s1820_s29, %s2150_s13 }
  0x77   : > { %p1828_p13 = por %p1827_p2, %p1826_p1 }
  0x78   : > { %p1824_p0 = pneg %p1823_p12 }
  0x79   : > { %p1830_p8 = por %p1829_p4, %p1828_p13 }
  0x7b   : > { %p1831_p6 = pnand %p1830_p8, %p1824_p0 }
  0x7d   : > { %1834 = shalt.err (!%p1831_p6)
}
  0x7e   : > { %s1835_s9 = scalar_lea.vmem %s2152_s8, 1024  ;;  %s1932_s15 = smov [#allocation2]  }
  0x7f   : > { %p1836_p3 = scmp.ne.s32.totalorder %s2152_s8, %s1835_s9  ;;  %s1840_s28 = sshll.u32 %s1932_s15, 4  ;;  %s1841_s28 = int_to_ptr.vmem [resolvable:$false] %s1840_s28 }
  0x80   : > { %s1842_s10 = scalar_lea.vmem %s1841_s28, 2048  ;;  %p1843_p12 = scmp.lt.s32.totalorder %s2152_s8, %s1841_s28 }
  0x81   : > { %p1838_p5 = pnand %p1836_p3, %p1822_p9  ;;  %p1844_p1 = scmp.lt.s32.totalorder %s1842_s10, %s1835_s9 }
  0x83   : > { %p1839_p7 = pneg %p1838_p5  ;;  %p1845_p2 = por %p1844_p1, %p1843_p12 }
  0x85   : > { %p1846_p13 = pnand %p1845_p2, %p1839_p7 }
  0x87   : > { %1849 = shalt.err (!%p1846_p13)
}
  0x88   : > { %1613 = dma.hbm_to_vmem [thread:$0]  (!%p2154_p11), %s2150_s13, 1024, %s2152_s8, %s2158_s6, %s1929_s23, %s1929_s23, %s1930_s27  }
  0x89   : > { %p2305_p9 = scmp.ne.s32.totalorder %s2299_s26, 0 }
  0x8a   : > { %s2192_s29 = sand.u32 (!%p2305_p9), 1, %s1916_s19   ;;  %p2306_p0 = scmp.ne.s32.totalorder (!%p2305_p9), %s2297_s24, 0 }
  0x8b   : > { %252 = sbr.rel (%p2305_p9) target bundleno = 1104 (0x450), region = 40  ;;  %s1332_s30 = sshll.u32 (!%p2305_p9), %s2192_s29, 6 }
  0x8c   : > { %s255_s11 = scalar_lea.sflag (!%p2305_p9), [#allocation3], %s2192_s29  ;;  %s2196_s12 = scalar_lea.vmem (!%p2305_p9), [#allocation2], %s1332_s30 }
  0x92   : > { %1895 = dma.done.wait (%p2306_p0), %s255_s11, 1024  }
  0x93   : > { %1897 = vsyncadd (%p2306_p0), %s255_s11, 4294966272  ;;  %p2307_p11 = scmp.eq.s32.totalorder %s1987_s22, 0 }
  0x95   : > { %1899 = dma.done.wait (%p2307_p11), [#allocation6], 2048   ;;  %p2308_p4 = pmov %p2307_p11 }
  0x97   : > { %1901 = vsyncadd (%p2308_p4), [#allocation6], 4294965248  ;;  %p2309_p8 = pmov %p2308_p4 }
  0x98   : > { %p2310_p6 = pmov %p2308_p4 }
  0x99   : > { %1903 = dma.done.wait (%p2309_p8), [#allocation9], 2048  }
  0x9a   : > { %1905 = vsyncadd (%p2310_p6), [#allocation9], 4294965248  ;;  %v1668_v0 = vld [vmem:[#allocation5] sm:$0xff]   ;;  %v1669_v1 = vld [vmem:[#allocation5 + $0x8] sm:$0xff]   ;;  %s1337_s24 = sshll.u32 %s2192_s29, 7  ;;  %s1384_s23 = sshll.u32 %s1987_s22, 11 }
  0x9b   : > { %1449 = vmatprep.subr.bf16.mxu0 %v1668_v0  ;;  %v1670_v2 = vld [vmem:[#allocation5 + $0x10] sm:$0xff]   ;;  %v1671_v3 = vld [vmem:[#allocation5 + $0x18] sm:$0xff]   ;;  %v1676_v4 = vld [vmem:[%s2196_s12] sm:$0xff]   ;;  %s2219_s26 = scalar_lea.vmem [#allocation11], %s1337_s24  ;;  %s2239_s16 = scalar_lea.hbm %s2293_s5, %s1384_s23 }
  0x9c   : > { %1450 = vmatpush3.bf16.msra.mxu0 %v1668_v0  ;;  %1465 = vmatprep.mubr.bf16.mxu0 %v1676_v4  ;;  %v1672_v5 = vld [vmem:[#allocation5 + $0x20] sm:$0xff]   ;;  %v1673_v6 = vld [vmem:[#allocation5 + $0x28] sm:$0xff]   ;;  %v1674_v9 = vld [vmem:[#allocation5 + $0x30] sm:$0xff]   ;;  %s1210_s27 = sshll.u32 %s2219_s26, 4  ;;  %s1197_s22 = scalar_lea.sflag [#allocation4], %s2192_s29  ;;  %s2241_s27 = int_to_ptr.vmem [resolvable:$true] %s1210_s27 }
  0x9d   : > { %1451 = vmatprep.subr.bf16.mxu0 %v1669_v1  ;;  %v1684_v7 = vld [vmem:[#allocation7] sm:$0xff]   ;;  %v1685_v8 = vld [vmem:[#allocation7 + $0x8] sm:$0xff]   ;;  %v1686_v10 = vld [vmem:[#allocation7 + $0x10] sm:$0xff]   ;;  %s1850_s6 = scalar_lea.vmem %s2241_s27, 2048  ;;  %s1933_s9 = smov [#allocation11]  }
  0x9e   : > { %1481 = vmatprep.subr.bf16.mxu1 %v1684_v7  ;;  %v1675_v11 = vld [vmem:[#allocation5 + $0x38] sm:$0xff]   ;;  %v1688_v13 = vld [vmem:[#allocation7 + $0x20] sm:$0xff]   ;;  %v1677_v14 = vld [vmem:[%s2196_s12 + $0x8] sm:$0xff]   ;;  %p1851_p3 = scmp.ne.s32.totalorder %s2241_s27, %s1850_s6  ;;  %s1854_s15 = sshll.u32 %s1933_s9, 4  ;;  %s1855_s15 = int_to_ptr.vmem [resolvable:$false] %s1854_s15 }
  0x9f   : > { %1482 = vmatpush3.bf16.msra.mxu1 %v1684_v7  ;;  %v1687_v12 = vld [vmem:[#allocation7 + $0x18] sm:$0xff]   ;;  %v1678_v15 = vld [vmem:[%s2196_s12 + $0x10] sm:$0xff]   ;;  %v1689_v16 = vld [vmem:[#allocation7 + $0x28] sm:$0xff]   ;;  %s1856_s28 = scalar_lea.vmem %s1855_s15, 4096  ;;  %p1857_p12 = scmp.lt.s32.totalorder %s2241_s27, %s1855_s15 }
  0xa0   : > { %1452 = vmatpush3.bf16.msra.mxu0 %v1669_v1  ;;  %1483 = vmatprep.subr.bf16.mxu1 %v1685_v8  ;;  %v1679_v17 = vld [vmem:[%s2196_s12 + $0x18] sm:$0xff]   ;;  %v1680_v18 = vld [vmem:[%s2196_s12 + $0x20] sm:$0xff]   ;;  %v1681_v19 = vld [vmem:[%s2196_s12 + $0x28] sm:$0xff]   ;;  %p1852_p5 = pnand %p1851_p3, %p2137_p10  ;;  %p1858_p1 = scmp.lt.s32.totalorder %s1856_s28, %s1850_s6 }
  0xa1   : > { %1453 = vmatprep.subr.bf16.mxu0 %v1670_v2  ;;  %v1682_v20 = vld [vmem:[%s2196_s12 + $0x30] sm:$0xff]   ;;  %v1683_v21 = vld [vmem:[%s2196_s12 + $0x38] sm:$0xff]   ;;  %v1692_v24 = vld [vmem:[#allocation8] sm:$0xff]  }
  0xa2   : > { %v1690_v22 = vld [vmem:[#allocation7 + $0x30] sm:$0xff]   ;;  %v1691_v23 = vld [vmem:[#allocation7 + $0x38] sm:$0xff]   ;;  %v1693_v25 = vld [vmem:[#allocation8 + $0x8] sm:$0xff]   ;;  %p1853_p7 = pneg %p1852_p5  ;;  %p1859_p2 = por %p1858_p1, %p1857_p12 }
  0xa3   : > { %1484 = vmatpush3.bf16.msra.mxu1 %v1685_v8  ;;  %v1694_v26 = vld [vmem:[#allocation8 + $0x10] sm:$0xff]   ;;  %v1695_v27 = vld [vmem:[#allocation8 + $0x18] sm:$0xff]   ;;  %v1696_v28 = vld [vmem:[#allocation8 + $0x20] sm:$0xff]  }
  0xa4   : > { %1454 = vmatpush3.bf16.msra.mxu0 %v1670_v2  ;;  %1485 = vmatprep.subr.bf16.mxu1 %v1686_v10  ;;  %v1697_v29 = vld [vmem:[#allocation8 + $0x28] sm:$0xff]   ;;  %p1860_p13 = pnand %p1859_p2, %p1853_p7 }
  0xa5   : > { %1455 = vmatprep.subr.bf16.mxu0 %v1671_v3 }
  0xa7   : > { %1486 = vmatpush3.bf16.msra.mxu1 %v1686_v10 }
  0xa8   : > { %1456 = vmatpush3.bf16.msra.mxu0 %v1671_v3  ;;  %1487 = vmatprep.subr.bf16.mxu1 %v1687_v12 }
  0xa9   : > { %1457 = vmatprep.subr.bf16.mxu0 %v1672_v5 }
  0xab   : > { %1488 = vmatpush3.bf16.msra.mxu1 %v1687_v12 }
  0xac   : > { %1458 = vmatpush3.bf16.msra.mxu0 %v1672_v5  ;;  %1489 = vmatprep.subr.bf16.mxu1 %v1688_v13 }
  0xad   : > { %1459 = vmatprep.subr.bf16.mxu0 %v1673_v6 }
  0xaf   : > { %1490 = vmatpush3.bf16.msra.mxu1 %v1688_v13 }
  0xb0   : > { %1460 = vmatpush3.bf16.msra.mxu0 %v1673_v6  ;;  %1491 = vmatprep.subr.bf16.mxu1 %v1689_v16 }
  0xb1   : > { %1461 = vmatprep.subr.bf16.mxu0 %v1674_v9 }
  0xb3   : > { %1492 = vmatpush3.bf16.msra.mxu1 %v1689_v16 }
  0xb4   : > { %1462 = vmatpush3.bf16.msra.mxu0 %v1674_v9  ;;  %1493 = vmatprep.subr.bf16.mxu1 %v1690_v22 }
  0xb5   : > { %1463 = vmatprep.subr.bf16.mxu0 %v1675_v11 }
  0xb7   : > { %1494 = vmatpush3.bf16.msra.mxu1 %v1690_v22  ;;  %v1698_v22 = vld [vmem:[#allocation8 + $0x30] sm:$0xff]  }
  0xb8   : > { %1464 = vmatpush3.bf16.msra.mxu0 %v1675_v11  ;;  %1495 = vmatprep.subr.bf16.mxu1 %v1691_v23 }
  0xb9   : > { %1513 = vmatprep.subr.bf16.mxu0 %v1692_v24 }
  0xbb   : > { %1466 = vmatmul.mubr.bf16.vlgmr.msra.gmra.mrb[0].mxu0 %v1677_v14  ;;  %1496 = vmatpush3.bf16.msra.mxu1 %v1691_v23  ;;  %v1699_v23 = vld [vmem:[#allocation8 + $0x38] sm:$0xff]  }
  0xbc   : > { %1469 = vmatprep.mubr.bf16.mxu0 %v1678_v15  ;;  %1514 = vmatpush3.bf16.msra.mxu0 %v1692_v24  ;;  %v1700_v24 = vld [vmem:[#allocation10] sm:$0xff]  }
  0xbd   : > { %1515 = vmatprep.subr.bf16.mxu0 %v1693_v25  ;;  %1545 = vmatprep.subr.bf16.mxu1 %v1700_v24 }
  0xc0   : > { %1516 = vmatpush3.bf16.msra.mxu0 %v1693_v25  ;;  %v1701_v25 = vld [vmem:[#allocation10 + $0x8] sm:$0xff]  }
  0xc1   : > { %1517 = vmatprep.subr.bf16.mxu0 %v1694_v26 }
  0xc3   : > { %1470 = vmatmul.mubr.bf16.gmra.mrb[4].mxu0 %v1679_v17 }
  0xc4   : > { %1473 = vmatprep.mubr.bf16.mxu0 %v1680_v18  ;;  %1518 = vmatpush3.bf16.msra.mxu0 %v1694_v26  ;;  %v1702_v26 = vld [vmem:[#allocation10 + $0x10] sm:$0xff]  }
  0xc5   : > { %1519 = vmatprep.subr.bf16.mxu0 %v1695_v27 }
  0xc8   : > { %1520 = vmatpush3.bf16.msra.mxu0 %v1695_v27  ;;  %v1703_v27 = vld [vmem:[#allocation10 + $0x18] sm:$0xff]  }
  0xc9   : > { %1521 = vmatprep.subr.bf16.mxu0 %v1696_v28 }
  0xcb   : > { %1474 = vmatmul.mubr.bf16.gmra.mrb[8].mxu0 %v1681_v19 }
  0xcc   : > { %1477 = vmatprep.mubr.bf16.mxu0 %v1682_v20  ;;  %1522 = vmatpush3.bf16.msra.mxu0 %v1696_v28  ;;  %v1704_v28 = vld [vmem:[#allocation10 + $0x20] sm:$0xff]  }
  0xcd   : > { %1523 = vmatprep.subr.bf16.mxu0 %v1697_v29 }
  0xd0   : > { %1524 = vmatpush3.bf16.msra.mxu0 %v1697_v29  ;;  %v1705_v29 = vld [vmem:[#allocation10 + $0x28] sm:$0xff]  }
  0xd1   : > { %1525 = vmatprep.subr.bf16.mxu0 %v1698_v22 }
  0xd3   : > { %1478 = vmatmul.mubr.bf16.gmra.mrb[12].mxu0 %v1683_v21 }
  0xd4   : > { %1526 = vmatpush3.bf16.msra.mxu0 %v1698_v22  ;;  %v1706_v22 = vld [vmem:[#allocation10 + $0x30] sm:$0xff]  }
  0xd5   : > { %1527 = vmatprep.subr.bf16.mxu0 %v1699_v23 }
  0xd8   : > { %1528 = vmatpush3.bf16.msra.mxu0 %v1699_v23  ;;  %v1707_v23 = vld [vmem:[#allocation10 + $0x38] sm:$0xff]  }
 0x18e   : > { %v1467_v30 = vpop.f32.mrb[0].mxu0 }
 0x18f   : > { %v547_v31 = vmul.f32 0.01, %v1467_v30  ;;  %v466_v32 = vpop.f32.mrb[1].mxu0  ;;  %vm531_vm0 = vcmp.gt.f32.partialorder %v1467_v30, 0.0 }
 0x190   : > { %v545_v33 = vmul.f32 0.01, %v466_v32  ;;  %v1468_v34 = vpop.f32.mrb[2].mxu0  ;;  %vm529_vm2 = vcmp.gt.f32.partialorder %v466_v32, 0.0 }
 0x191   : > { %vm532_vm1 = vcmp.gt.f32.partialorder %v1468_v34, 0.0  ;;  %v548_v35 = vmul.f32 0.01, %v1468_v34  ;;  %v469_v36 = vpop.f32.mrb[3].mxu0  ;;  %v563_v38 = vsel %vm531_vm0, %v1467_v30, %v547_v31 }
 0x192   : > { %v546_v37 = vmul.f32 0.01, %v469_v36  ;;  %vm530_vm3 = vcmp.gt.f32.partialorder %v469_v36, 0.0  ;;  %v561_v40 = vsel %vm529_vm2, %v466_v32, %v545_v33 }
 0x193   : > { %v564_v39 = vsel %vm532_vm1, %v1468_v34, %v548_v35 }
 0x194   : > { %v562_v41 = vsel %vm530_vm3, %v469_v36, %v546_v37  ;;  %v578_v42 = vpack.c.bf16 %v564_v39, %v563_v38 }
 0x195   : > { %v577_v43 = vpack.c.bf16 %v562_v41, %v561_v40 }
 0x196   : > { %v1471_v44 = vpop.f32.mrb[4].mxu0 }
 0x197   : > { %v551_v45 = vmul.f32 0.01, %v1471_v44  ;;  %v482_v46 = vpop.f32.mrb[5].mxu0  ;;  %1497 = vmatprep.mubr.bf16.mxu1 %v577_v43  ;;  %vm535_vm4 = vcmp.gt.f32.partialorder %v1471_v44, 0.0 }
 0x198   : > { %v549_v47 = vmul.f32 0.01, %v482_v46  ;;  %v1472_v48 = vpop.f32.mrb[6].mxu0  ;;  %1498 = vmatmul.mubr.bf16.vlgmr.msra.gmra.mrb[0].mxu1 %v578_v42  ;;  %vm533_vm5 = vcmp.gt.f32.partialorder %v482_v46, 0.0 }
 0x199   : > { %vm536_vm6 = vcmp.gt.f32.partialorder %v1472_v48, 0.0  ;;  %v552_v49 = vmul.f32 0.01, %v1472_v48  ;;  %v485_v50 = vpop.f32.mrb[7].mxu0  ;;  %v567_v52 = vsel %vm535_vm4, %v1471_v44, %v551_v45  ;;  %1546 = vmatpush3.bf16.msra.mxu1 %v1700_v24 }
 0x19a   : > { %vm534_vm7 = vcmp.gt.f32.partialorder %v485_v50, 0.0  ;;  %v550_v51 = vmul.f32 0.01, %v485_v50  ;;  %v565_v54 = vsel %vm533_vm5, %v482_v46, %v549_v47  ;;  %1547 = vmatprep.subr.bf16.mxu1 %v1701_v25 }
 0x19b   : > { %v568_v53 = vsel %vm536_vm6, %v1472_v48, %v552_v49 }
 0x19c   : > { %v566_v55 = vsel %vm534_vm7, %v485_v50, %v550_v51  ;;  %v580_v56 = vpack.c.bf16 %v568_v53, %v567_v52 }
 0x19d   : > { %v579_v57 = vpack.c.bf16 %v566_v55, %v565_v54  ;;  %1548 = vmatpush3.bf16.msra.mxu1 %v1701_v25 }
 0x19e   : > { %v1475_v58 = vpop.f32.mrb[8].mxu0  ;;  %1549 = vmatprep.subr.bf16.mxu1 %v1702_v26 }
 0x19f   : > { %v555_v59 = vmul.f32 0.01, %v1475_v58  ;;  %v498_v60 = vpop.f32.mrb[9].mxu0  ;;  %1501 = vmatprep.mubr.bf16.mxu1 %v579_v57  ;;  %vm539_vm8 = vcmp.gt.f32.partialorder %v1475_v58, 0.0 }
 0x1a0   : > { %v553_v61 = vmul.f32 0.01, %v498_v60  ;;  %v1476_v62 = vpop.f32.mrb[10].mxu0  ;;  %1502 = vmatmul.mubr.bf16.gmra.mrb[4].mxu1 %v580_v56  ;;  %vm537_vm9 = vcmp.gt.f32.partialorder %v498_v60, 0.0 }
 0x1a1   : > { %vm540_vm10 = vcmp.gt.f32.partialorder %v1476_v62, 0.0  ;;  %v556_v63 = vmul.f32 0.01, %v1476_v62  ;;  %v501_v0 = vpop.f32.mrb[11].mxu0  ;;  %v571_v2 = vsel %vm539_vm8, %v1475_v58, %v555_v59  ;;  %1550 = vmatpush3.bf16.msra.mxu1 %v1702_v26 }
 0x1a2   : > { %vm538_vm11 = vcmp.gt.f32.partialorder %v501_v0, 0.0  ;;  %v554_v1 = vmul.f32 0.01, %v501_v0  ;;  %v569_v4 = vsel %vm537_vm9, %v498_v60, %v553_v61  ;;  %1551 = vmatprep.subr.bf16.mxu1 %v1703_v27 }
 0x1a3   : > { %v572_v3 = vsel %vm540_vm10, %v1476_v62, %v556_v63 }
 0x1a4   : > { %v570_v5 = vsel %vm538_vm11, %v501_v0, %v554_v1  ;;  %v582_v6 = vpack.c.bf16 %v572_v3, %v571_v2 }
 0x1a5   : > { %v581_v7 = vpack.c.bf16 %v570_v5, %v569_v4  ;;  %1552 = vmatpush3.bf16.msra.mxu1 %v1703_v27 }
 0x1a6   : > { %v1479_v8 = vpop.f32.mrb[12].mxu0  ;;  %1553 = vmatprep.subr.bf16.mxu1 %v1704_v28 }
 0x1a7   : > { %v559_v9 = vmul.f32 0.01, %v1479_v8  ;;  %v514_v10 = vpop.f32.mrb[13].mxu0  ;;  %1505 = vmatprep.mubr.bf16.mxu1 %v581_v7  ;;  %vm543_vm12 = vcmp.gt.f32.partialorder %v1479_v8, 0.0 }
 0x1a8   : > { %v557_v11 = vmul.f32 0.01, %v514_v10  ;;  %v1480_v12 = vpop.f32.mrb[14].mxu0  ;;  %1506 = vmatmul.mubr.bf16.gmra.mrb[8].mxu1 %v582_v6  ;;  %vm541_vm13 = vcmp.gt.f32.partialorder %v514_v10, 0.0 }
 0x1a9   : > { %vm544_vm14 = vcmp.gt.f32.partialorder %v1480_v12, 0.0  ;;  %v560_v13 = vmul.f32 0.01, %v1480_v12  ;;  %v517_v14 = vpop.f32.mrb[15].mxu0  ;;  %v575_v16 = vsel %vm543_vm12, %v1479_v8, %v559_v9  ;;  %1554 = vmatpush3.bf16.msra.mxu1 %v1704_v28 }
 0x1aa   : > { %vm542_vm15 = vcmp.gt.f32.partialorder %v517_v14, 0.0  ;;  %v558_v15 = vmul.f32 0.01, %v517_v14  ;;  %v573_v18 = vsel %vm541_vm13, %v514_v10, %v557_v11  ;;  %1555 = vmatprep.subr.bf16.mxu1 %v1705_v29 }
 0x1ab   : > { %v576_v17 = vsel %vm544_vm14, %v1480_v12, %v560_v13 }
 0x1ac   : > { %v574_v19 = vsel %vm542_vm15, %v517_v14, %v558_v15  ;;  %v584_v20 = vpack.c.bf16 %v576_v17, %v575_v16 }
 0x1ad   : > { %v583_v21 = vpack.c.bf16 %v574_v19, %v573_v18  ;;  %1556 = vmatpush3.bf16.msra.mxu1 %v1705_v29 }
 0x1ae   : > { %1557 = vmatprep.subr.bf16.mxu1 %v1706_v22 }
 0x1af   : > { %1509 = vmatprep.mubr.bf16.mxu1 %v583_v21 }
 0x1b0   : > { %1510 = vmatmul.mubr.bf16.gmra.mrb[12].mxu1 %v584_v20 }
 0x1b1   : > { %1558 = vmatpush3.bf16.msra.mxu1 %v1706_v22 }
 0x1b2   : > { %1559 = vmatprep.subr.bf16.mxu1 %v1707_v23 }
 0x1b5   : > { %1560 = vmatpush3.bf16.msra.mxu1 %v1707_v23 }
 0x26b   : > { %v1499_v30 = vpop.f32.mrb[0].mxu1 }
 0x26c   : > { %v764_v31 = vmul.f32 0.01, %v1499_v30  ;;  %v683_v32 = vpop.f32.mrb[1].mxu1  ;;  %vm748_vm0 = vcmp.gt.f32.partialorder %v1499_v30, 0.0 }
 0x26d   : > { %v762_v33 = vmul.f32 0.01, %v683_v32  ;;  %v1500_v34 = vpop.f32.mrb[2].mxu1  ;;  %vm746_vm1 = vcmp.gt.f32.partialorder %v683_v32, 0.0 }
 0x26e   : > { %vm749_vm2 = vcmp.gt.f32.partialorder %v1500_v34, 0.0  ;;  %v765_v35 = vmul.f32 0.01, %v1500_v34  ;;  %v686_v36 = vpop.f32.mrb[3].mxu1  ;;  %v780_v38 = vsel %vm748_vm0, %v1499_v30, %v764_v31 }
 0x26f   : > { %vm747_vm3 = vcmp.gt.f32.partialorder %v686_v36, 0.0  ;;  %v763_v37 = vmul.f32 0.01, %v686_v36  ;;  %v778_v40 = vsel %vm746_vm1, %v683_v32, %v762_v33 }
 0x270   : > { %v781_v39 = vsel %vm749_vm2, %v1500_v34, %v765_v35 }
 0x271   : > { %v795_v41 = vpack.c.bf16 %v781_v39, %v780_v38  ;;  %v779_v42 = vsel %vm747_vm3, %v686_v36, %v763_v37 }
 0x272   : > { %v794_v43 = vpack.c.bf16 %v779_v42, %v778_v40 }
 0x273   : > { %v1503_v44 = vpop.f32.mrb[4].mxu1 }
 0x274   : > { %v768_v45 = vmul.f32 0.01, %v1503_v44  ;;  %v699_v46 = vpop.f32.mrb[5].mxu1  ;;  %1529 = vmatprep.mubr.bf16.mxu0 %v794_v43  ;;  %vm752_vm4 = vcmp.gt.f32.partialorder %v1503_v44, 0.0 }
 0x275   : > { %v766_v47 = vmul.f32 0.01, %v699_v46  ;;  %v1504_v48 = vpop.f32.mrb[6].mxu1  ;;  %1530 = vmatmul.mubr.bf16.vlgmr.msra.gmra.mrb[16].mxu0 %v795_v41  ;;  %vm750_vm5 = vcmp.gt.f32.partialorder %v699_v46, 0.0 }
 0x276   : > { %vm753_vm6 = vcmp.gt.f32.partialorder %v1504_v48, 0.0  ;;  %v769_v49 = vmul.f32 0.01, %v1504_v48  ;;  %v702_v50 = vpop.f32.mrb[7].mxu1  ;;  %v784_v52 = vsel %vm752_vm4, %v1503_v44, %v768_v45 }
 0x277   : > { %vm751_vm7 = vcmp.gt.f32.partialorder %v702_v50, 0.0  ;;  %v767_v51 = vmul.f32 0.01, %v702_v50  ;;  %v782_v54 = vsel %vm750_vm5, %v699_v46, %v766_v47 }
 0x278   : > { %v785_v53 = vsel %vm753_vm6, %v1504_v48, %v769_v49 }
 0x279   : > { %v783_v55 = vsel %vm751_vm7, %v702_v50, %v767_v51  ;;  %v797_v56 = vpack.c.bf16 %v785_v53, %v784_v52 }
 0x27a   : > { %v796_v57 = vpack.c.bf16 %v783_v55, %v782_v54 }
 0x27b   : > { %v1507_v58 = vpop.f32.mrb[8].mxu1 }
 0x27c   : > { %v772_v59 = vmul.f32 0.01, %v1507_v58  ;;  %v715_v60 = vpop.f32.mrb[9].mxu1  ;;  %1533 = vmatprep.mubr.bf16.mxu0 %v796_v57  ;;  %vm756_vm8 = vcmp.gt.f32.partialorder %v1507_v58, 0.0 }
 0x27d   : > { %v770_v61 = vmul.f32 0.01, %v715_v60  ;;  %v1508_v62 = vpop.f32.mrb[10].mxu1  ;;  %1534 = vmatmul.mubr.bf16.gmra.mrb[20].mxu0 %v797_v56  ;;  %vm754_vm9 = vcmp.gt.f32.partialorder %v715_v60, 0.0 }
 0x27e   : > { %vm757_vm10 = vcmp.gt.f32.partialorder %v1508_v62, 0.0  ;;  %v773_v63 = vmul.f32 0.01, %v1508_v62  ;;  %v718_v0 = vpop.f32.mrb[11].mxu1  ;;  %v788_v2 = vsel %vm756_vm8, %v1507_v58, %v772_v59 }
 0x27f   : > { %vm755_vm11 = vcmp.gt.f32.partialorder %v718_v0, 0.0  ;;  %v771_v1 = vmul.f32 0.01, %v718_v0  ;;  %v786_v4 = vsel %vm754_vm9, %v715_v60, %v770_v61 }
 0x280   : > { %v789_v3 = vsel %vm757_vm10, %v1508_v62, %v773_v63 }
 0x281   : > { %v787_v5 = vsel %vm755_vm11, %v718_v0, %v771_v1  ;;  %v799_v6 = vpack.c.bf16 %v789_v3, %v788_v2 }
 0x282   : > { %v798_v7 = vpack.c.bf16 %v787_v5, %v786_v4 }
 0x283   : > { %v1511_v8 = vpop.f32.mrb[12].mxu1 }
 0x284   : > { %v776_v9 = vmul.f32 0.01, %v1511_v8  ;;  %v731_v10 = vpop.f32.mrb[13].mxu1  ;;  %1537 = vmatprep.mubr.bf16.mxu0 %v798_v7  ;;  %vm760_vm12 = vcmp.gt.f32.partialorder %v1511_v8, 0.0 }
 0x285   : > { %v774_v11 = vmul.f32 0.01, %v731_v10  ;;  %v1512_v12 = vpop.f32.mrb[14].mxu1  ;;  %1538 = vmatmul.mubr.bf16.gmra.mrb[24].mxu0 %v799_v6  ;;  %vm758_vm13 = vcmp.gt.f32.partialorder %v731_v10, 0.0 }
 0x286   : > { %vm761_vm14 = vcmp.gt.f32.partialorder %v1512_v12, 0.0  ;;  %v777_v13 = vmul.f32 0.01, %v1512_v12  ;;  %v734_v14 = vpop.f32.mrb[15].mxu1  ;;  %v792_v16 = vsel %vm760_vm12, %v1511_v8, %v776_v9 }
 0x287   : > { %vm759_vm15 = vcmp.gt.f32.partialorder %v734_v14, 0.0  ;;  %v775_v15 = vmul.f32 0.01, %v734_v14  ;;  %v790_v18 = vsel %vm758_vm13, %v731_v10, %v774_v11 }
 0x288   : > { %v793_v17 = vsel %vm761_vm14, %v1512_v12, %v777_v13 }
 0x289   : > { %v791_v19 = vsel %vm759_vm15, %v734_v14, %v775_v15  ;;  %v801_v20 = vpack.c.bf16 %v793_v17, %v792_v16 }
 0x28a   : > { %v800_v21 = vpack.c.bf16 %v791_v19, %v790_v18 }
 0x28c   : > { %1541 = vmatprep.mubr.bf16.mxu0 %v800_v21 }
 0x28d   : > { %1542 = vmatmul.mubr.bf16.gmra.mrb[28].mxu0 %v801_v20 }
 0x348   : > { %v1531_v24 = vpop.f32.mrb[16].mxu0 }
 0x349   : > { %v981_v25 = vmul.f32 0.01, %v1531_v24  ;;  %v900_v26 = vpop.f32.mrb[17].mxu0  ;;  %vm965_vm0 = vcmp.gt.f32.partialorder %v1531_v24, 0.0 }
 0x34a   : > { %v979_v27 = vmul.f32 0.01, %v900_v26  ;;  %v1532_v28 = vpop.f32.mrb[18].mxu0  ;;  %vm963_vm1 = vcmp.gt.f32.partialorder %v900_v26, 0.0 }
 0x34b   : > { %vm966_vm2 = vcmp.gt.f32.partialorder %v1532_v28, 0.0  ;;  %v982_v29 = vmul.f32 0.01, %v1532_v28  ;;  %v903_v30 = vpop.f32.mrb[19].mxu0  ;;  %v997_v32 = vsel %vm965_vm0, %v1531_v24, %v981_v25 }
 0x34c   : > { %vm964_vm3 = vcmp.gt.f32.partialorder %v903_v30, 0.0  ;;  %v980_v31 = vmul.f32 0.01, %v903_v30  ;;  %v995_v34 = vsel %vm963_vm1, %v900_v26, %v979_v27 }
 0x34d   : > { %v998_v33 = vsel %vm966_vm2, %v1532_v28, %v982_v29 }
 0x34e   : > { %v1012_v35 = vpack.c.bf16 %v998_v33, %v997_v32  ;;  %v996_v36 = vsel %vm964_vm3, %v903_v30, %v980_v31 }
 0x34f   : > { %v1011_v37 = vpack.c.bf16 %v996_v36, %v995_v34 }
 0x350   : > { %v1535_v38 = vpop.f32.mrb[20].mxu0 }
 0x351   : > { %v985_v39 = vmul.f32 0.01, %v1535_v38  ;;  %v916_v40 = vpop.f32.mrb[21].mxu0  ;;  %1561 = vmatprep.mubr.bf16.mxu1 %v1011_v37  ;;  %vm969_vm4 = vcmp.gt.f32.partialorder %v1535_v38, 0.0 }
 0x352   : > { %v983_v41 = vmul.f32 0.01, %v916_v40  ;;  %v1536_v42 = vpop.f32.mrb[22].mxu0  ;;  %1562 = vmatmul.mubr.bf16.vlgmr.msra.gmra.mrb[16].mxu1 %v1012_v35  ;;  %vm967_vm5 = vcmp.gt.f32.partialorder %v916_v40, 0.0 }
 0x353   : > { %vm970_vm6 = vcmp.gt.f32.partialorder %v1536_v42, 0.0  ;;  %v986_v43 = vmul.f32 0.01, %v1536_v42  ;;  %v919_v44 = vpop.f32.mrb[23].mxu0  ;;  %v1001_v46 = vsel %vm969_vm4, %v1535_v38, %v985_v39 }
 0x354   : > { %vm968_vm7 = vcmp.gt.f32.partialorder %v919_v44, 0.0  ;;  %v984_v45 = vmul.f32 0.01, %v919_v44  ;;  %v999_v48 = vsel %vm967_vm5, %v916_v40, %v983_v41 }
 0x355   : > { %v1002_v47 = vsel %vm970_vm6, %v1536_v42, %v986_v43 }
 0x356   : > { %v1000_v49 = vsel %vm968_vm7, %v919_v44, %v984_v45  ;;  %v1014_v50 = vpack.c.bf16 %v1002_v47, %v1001_v46 }
 0x357   : > { %v1013_v51 = vpack.c.bf16 %v1000_v49, %v999_v48 }
 0x358   : > { %v1539_v52 = vpop.f32.mrb[24].mxu0 }
 0x359   : > { %v989_v53 = vmul.f32 0.01, %v1539_v52  ;;  %v932_v54 = vpop.f32.mrb[25].mxu0  ;;  %1565 = vmatprep.mubr.bf16.mxu1 %v1013_v51  ;;  %vm973_vm8 = vcmp.gt.f32.partialorder %v1539_v52, 0.0 }
 0x35a   : > { %v987_v55 = vmul.f32 0.01, %v932_v54  ;;  %v1540_v56 = vpop.f32.mrb[26].mxu0  ;;  %1566 = vmatmul.mubr.bf16.gmra.mrb[20].mxu1 %v1014_v50  ;;  %vm971_vm9 = vcmp.gt.f32.partialorder %v932_v54, 0.0 }
 0x35b   : > { %vm974_vm10 = vcmp.gt.f32.partialorder %v1540_v56, 0.0  ;;  %v990_v57 = vmul.f32 0.01, %v1540_v56  ;;  %v935_v58 = vpop.f32.mrb[27].mxu0  ;;  %v1005_v60 = vsel %vm973_vm8, %v1539_v52, %v989_v53 }
 0x35c   : > { %vm972_vm11 = vcmp.gt.f32.partialorder %v935_v58, 0.0  ;;  %v988_v59 = vmul.f32 0.01, %v935_v58  ;;  %v1003_v62 = vsel %vm971_vm9, %v932_v54, %v987_v55 }
 0x35d   : > { %v1006_v61 = vsel %vm974_vm10, %v1540_v56, %v990_v57 }
 0x35e   : > { %v1004_v63 = vsel %vm972_vm11, %v935_v58, %v988_v59  ;;  %v1016_v0 = vpack.c.bf16 %v1006_v61, %v1005_v60 }
 0x35f   : > { %v1015_v1 = vpack.c.bf16 %v1004_v63, %v1003_v62 }
 0x360   : > { %v1543_v2 = vpop.f32.mrb[28].mxu0 }
 0x361   : > { %v993_v3 = vmul.f32 0.01, %v1543_v2  ;;  %v948_v4 = vpop.f32.mrb[29].mxu0  ;;  %1569 = vmatprep.mubr.bf16.mxu1 %v1015_v1  ;;  %vm977_vm12 = vcmp.gt.f32.partialorder %v1543_v2, 0.0 }
 0x362   : > { %v991_v5 = vmul.f32 0.01, %v948_v4  ;;  %v1544_v6 = vpop.f32.mrb[30].mxu0  ;;  %1570 = vmatmul.mubr.bf16.gmra.mrb[24].mxu1 %v1016_v0  ;;  %vm975_vm13 = vcmp.gt.f32.partialorder %v948_v4, 0.0 }
 0x363   : > { %vm978_vm14 = vcmp.gt.f32.partialorder %v1544_v6, 0.0  ;;  %v994_v7 = vmul.f32 0.01, %v1544_v6  ;;  %v951_v8 = vpop.f32.mrb[31].mxu0  ;;  %v1009_v10 = vsel %vm977_vm12, %v1543_v2, %v993_v3 }
 0x364   : > { %vm976_vm15 = vcmp.gt.f32.partialorder %v951_v8, 0.0  ;;  %v992_v9 = vmul.f32 0.01, %v951_v8  ;;  %v1007_v12 = vsel %vm975_vm13, %v948_v4, %v991_v5 }
 0x365   : > { %v1010_v11 = vsel %vm978_vm14, %v1544_v6, %v994_v7 }
 0x366   : > { %v1008_v13 = vsel %vm976_vm15, %v951_v8, %v992_v9  ;;  %v1018_v14 = vpack.c.bf16 %v1010_v11, %v1009_v10 }
 0x367   : > { %v1017_v15 = vpack.c.bf16 %v1008_v13, %v1007_v12 }
 0x369   : > { %1573 = vmatprep.mubr.bf16.mxu1 %v1017_v15 }
 0x36a   : > { %1574 = vmatmul.mubr.bf16.gmra.mrb[28].mxu1 %v1018_v14 }
 0x425   : > { %v1563_v16 = vpop.f32.mrb[16].mxu1 }
 0x426   : > { %1182 = vst [vmem:[%s2219_s26 + $0x10] sm:$0xff] %v1563_v16  ;;  %v1117_v17 = vpop.f32.mrb[17].mxu1 }
 0x427   : > { %1180 = vst [vmem:[%s2219_s26] sm:$0xff] %v1117_v17  ;;  %v1564_v18 = vpop.f32.mrb[18].mxu1 }
 0x428   : > { %1183 = vst [vmem:[%s2219_s26 + $0x18] sm:$0xff] %v1564_v18  ;;  %v1120_v19 = vpop.f32.mrb[19].mxu1 }
 0x429   : > { %1181 = vst [vmem:[%s2219_s26 + $0x8] sm:$0xff] %v1120_v19 }
 0x42d   : > { %v1567_v20 = vpop.f32.mrb[20].mxu1 }
 0x42e   : > { %1186 = vst [vmem:[%s2219_s26 + $0x30] sm:$0xff] %v1567_v20  ;;  %v1133_v21 = vpop.f32.mrb[21].mxu1 }
 0x42f   : > { %1184 = vst [vmem:[%s2219_s26 + $0x20] sm:$0xff] %v1133_v21  ;;  %v1568_v22 = vpop.f32.mrb[22].mxu1 }
 0x430   : > { %1187 = vst [vmem:[%s2219_s26 + $0x38] sm:$0xff] %v1568_v22  ;;  %v1136_v23 = vpop.f32.mrb[23].mxu1 }
 0x431   : > { %1185 = vst [vmem:[%s2219_s26 + $0x28] sm:$0xff] %v1136_v23 }
 0x435   : > { %v1571_v24 = vpop.f32.mrb[24].mxu1 }
 0x436   : > { %1190 = vst [vmem:[%s2219_s26 + $0x50] sm:$0xff] %v1571_v24  ;;  %v1149_v25 = vpop.f32.mrb[25].mxu1 }
 0x437   : > { %1188 = vst [vmem:[%s2219_s26 + $0x40] sm:$0xff] %v1149_v25  ;;  %v1572_v26 = vpop.f32.mrb[26].mxu1 }
 0x438   : > { %1191 = vst [vmem:[%s2219_s26 + $0x58] sm:$0xff] %v1572_v26  ;;  %v1152_v27 = vpop.f32.mrb[27].mxu1 }
 0x439   : > { %1189 = vst [vmem:[%s2219_s26 + $0x48] sm:$0xff] %v1152_v27 }
 0x43d   : > { %v1575_v28 = vpop.f32.mrb[28].mxu1 }
 0x43e   : > { %1194 = vst [vmem:[%s2219_s26 + $0x70] sm:$0xff] %v1575_v28  ;;  %v1165_v29 = vpop.f32.mrb[29].mxu1 }
 0x43f   : > { %1192 = vst [vmem:[%s2219_s26 + $0x60] sm:$0xff] %v1165_v29  ;;  %v1576_v30 = vpop.f32.mrb[30].mxu1 }
 0x440   : > { %1195 = vst [vmem:[%s2219_s26 + $0x78] sm:$0xff] %v1576_v30  ;;  %v1168_v31 = vpop.f32.mrb[31].mxu1 }
 0x441   : > { %1193 = vst [vmem:[%s2219_s26 + $0x68] sm:$0xff] %v1168_v31 }
 0x442   : > { %1863 = shalt.err (!%p1860_p13)
}
 0x443   : > { %s1864_s10 = scalar_lea.hbm %s2239_s16, 2048  ;;  %s1868_s12 = scalar_lea.hbm %s2293_s5, 4096 }
 0x444   : > { %p1865_p9 = scmp.ne.s32.totalorder %s2239_s16, %s1864_s10  ;;  %p1869_p4 = scmp.lt.u32.totalorder %s2239_s16, %s2293_s5 }
 0x445   : > { %p1870_p8 = scmp.lt.u32.totalorder %s1868_s12, %s1864_s10  ;;  %p1872_p3 = scmp.lt.u32.totalorder %s1864_s10, %s2239_s16 }
 0x446   : > { %p1866_p0 = pnand %p1865_p9, %p2137_p10 }
 0x447   : > { %p1871_p6 = por %p1870_p8, %p1869_p4 }
 0x448   : > { %p1867_p11 = pneg %p1866_p0 }
 0x449   : > { %p1873_p5 = por %p1872_p3, %p1871_p6 }
 0x44b   : > { %p1874_p7 = pnand %p1873_p5, %p1867_p11 }
 0x44d   : > { %1877 = shalt.err (!%p1874_p7)
}
 0x44e   : > { %s1934_s23 = smov 128   ;;  %s1935_s13 = smov 8  }
 0x44f   : > { %1595 = dma.vmem_to_hbm [thread:$0]  (%p2137_p10), %s2241_s27, 2048, %s2239_s16, %s1197_s22, %s1934_s23, %s1934_s23, %s1935_s13  }
 0x450 PF: > { %s1225_s8 = sand.u32 1, %s1912_s18   ;;  %p2311_p12 = scmp.ne.s32.totalorder %s2298_s25, 0 }
 0x451   : > { %p2312_p1 = scmp.ge.s32.totalorder %s1924_s21, 2  ;;  %s1226_s6 = scalar_lea.sflag [#allocation4], %s1225_s8 }
 0x453   : > { %p1615_p2 = pnand %p2312_p1, %p2311_p12 }
 0x455   : > { %1907 = dma.done.wait (!%p1615_p2), %s1226_s6, 2048  }
 0x456   : > { %1909 = vsyncadd (!%p1615_p2), %s1226_s6, 4294965248  ;;  %p20_p13 = scmp.ge.s32.totalorder %s2127_s14, 4   ;;  %s2313_s18 = smov %s1916_s19 }
 0x457   : > { %s2314_s19 = smov %s1920_s20  ;;  %s2315_s20 = smov %s2143_s7 }
 0x458   : > { %s2316_s21 = smov %s2127_s14  ;;  %22 = sbr.rel (!%p20_p13) target bundleno = 7 (0x7), region = 101 }
 0x45f   :  { %1231 = vsyncpa [#allocation3], 1 }
 0x460   :  { %1233 = vsyncpa [#allocation3 + $0x1], 1 }
 0x461   :  { %1234 = vsyncpa [#allocation6], 1 }
 0x462   :  { %1235 = vsyncpa [#allocation9], 1 }
 0x463   :  { %1236 = vsyncpa [#allocation4], 1 }
 0x464   :  { %1238 = vsyncpa [#allocation4 + $0x1], 1 }

</bundles_post_ra>
